<compile_context>
chip_gen: v7x
topology: tpu7x:2x2x1
jax: 0.10.0
libtpu: 0.0.40
codegen_flags: <defaults>
</compile_context>

<pallas_src>
import functools
import math

import jax
import jax.numpy as jnp
from jax.experimental import pallas as pl
from jax.experimental.pallas import tpu as pltpu

_LANES = 128
_TILE_ROWS = 8192                        # (8192, 128) f32 = 4 MiB per block
_ELEMWISE_VMEM_LIMIT = 32 * 1024 * 1024  # 2in+2out x 4 MiB = 16 MiB > v5e default
_LINEAR_SMALL_BYTES = 2 * 1024 * 1024    # below this the matmul runs as 1 block
_VMEM = pltpu.MemorySpace.VMEM
_SMEM = pltpu.MemorySpace.SMEM


def _round_up(v, m):
    return ((v + m - 1) // m) * m


def _pick_tile(dim, pref, gran):
    """Tile size (multiple of `gran`, capped at `pref`) and padded extent."""
    r = _round_up(dim, gran)
    if r <= pref:
        return r, r
    return pref, _round_up(dim, pref)


def _to_lane2d(x):
    """Flatten `x` to a lane-dense (rows, 128) view.

    When the total element count is a multiple of 128 this is a pure reshape
    (no HBM copy).  Only the rare ragged (<128 element) tail falls back to a
    pad copy.
    """
    flat = x.reshape(-1)
    total = flat.shape[0]
    if total % _LANES == 0:
        return flat.reshape(-1, _LANES), total, False
    # TODO(synk): the <128-element ragged tail still costs one pad copy; a
    # masked tail kernel would avoid it, but no such shape appears here.
    flat = jnp.pad(flat, (0, _LANES - total % _LANES))
    return flat.reshape(-1, _LANES), total, True


# ---------------------------------------------------------------------------
# kernel 1: global max(|x|)  (compute_delta with overflow_rate == 0)
# ---------------------------------------------------------------------------
def _maxabs_small_kernel(x_ref, out_ref):
    out_ref[0, 0] = jnp.max(jnp.abs(x_ref[...].astype(jnp.float32)))


def _maxabs_tiled_kernel(x_ref, part_ref, *, valid_rows, tile_rows, mask_tail):
    a = jnp.abs(x_ref[...].astype(jnp.float32))
    if mask_tail:
        # Last block is partial: out-of-bounds rows are unspecified, zero them
        # (zero is neutral for the |x| max).
        rid = jax.lax.broadcasted_iota(jnp.int32, a.shape, 0)
        remaining = valid_rows - pl.program_id(0) * tile_rows
        a = jnp.where(rid < remaining, a, 0.0)
    # Fold (tile_rows, 128) -> (8, 128) with VPU elementwise maxima only; the
    # final cross-lane reduce over the tiny partials array happens in XLA.
    part_ref[...] = jnp.max(a.reshape(-1, 8, _LANES), axis=0)


def max_abs_pallas(x):
    """Global max(|x|) as a Pallas reduction."""
    x2d, _, _ = _to_lane2d(x)
    rows = x2d.shape[0]

    if rows <= _TILE_ROWS:
        out = pl.pallas_call(
            _maxabs_small_kernel,
            out_shape=jax.ShapeDtypeStruct((1, 1), jnp.float32),
            in_specs=[pl.BlockSpec(memory_space=_VMEM)],
            out_specs=pl.BlockSpec(memory_space=_SMEM),
        )(x2d)
        return out[0, 0]

    nblk = pl.cdiv(rows, _TILE_ROWS)
    mask_tail = (rows % _TILE_ROWS) != 0
    kernel = functools.partial(_maxabs_tiled_kernel, valid_rows=rows,
                               tile_rows=_TILE_ROWS, mask_tail=mask_tail)
    partials = pl.pallas_call(
        kernel,
        out_shape=jax.ShapeDtypeStruct((nblk * 8, _LANES), jnp.float32),
        grid=(nblk,),
        in_specs=[pl.BlockSpec((_TILE_ROWS, _LANES), lambda i: (i, 0))],
        out_specs=pl.BlockSpec((8, _LANES), lambda i: (i, 0)),
        compiler_params=pltpu.CompilerParams(
            dimension_semantics=("parallel",),
            vmem_limit_bytes=_ELEMWISE_VMEM_LIMIT),
    )(x2d)
    return jnp.max(partials)


def compute_delta(input, bits, overflow_rate=0.0):
    """Port of compute_delta(); returns a Python float (like torch .item()).

    The log2/ceil stays on the host (f64) for exact parity with the PyTorch
    reference; it runs only during calibration and once when the quantized
    weights are cached, so the device->host sync is off the steady-state path.
    """
    if overflow_rate == 0.0:
        v = float(max_abs_pallas(input))
    else:
        # TODO(synk): overflow_rate > 0 needs a global descending sort /
        # quantile with no clean Pallas equivalent; fall back to XLA sort.
        abs_sorted = jnp.sort(jnp.abs(input).reshape(-1))[::-1]
        split_idx = int(overflow_rate * abs_sorted.shape[0])
        v = float(abs_sorted[split_idx])
    si = math.ceil(math.log(v + 1e-12, 2))
    sf = bits - 1 - si
    return math.pow(2.0, -sf)


# ---------------------------------------------------------------------------
# kernel 2: linear_quantize2 (elementwise)
# ---------------------------------------------------------------------------
def _quantize_value(x, bits, inv_delta):
    bound = float(2.0 ** (bits - 1))
    return jnp.clip(jnp.floor(x * inv_delta + 0.5), -bound, bound - 1.0)


def _quantize_kernel(x_ref, o_ref, *, bits, inv_delta):
    q = _quantize_value(x_ref[...].astype(jnp.float32), bits, inv_delta)
    o_ref[...] = q.astype(o_ref.dtype)


def linear_quantize2_pallas(x, bits, delta):
    """Port of linear_quantize2(): floor(x/delta + .5) clipped to signed range.

    delta is an exact power of two, so multiplying by the baked-in 1/delta is
    bit-identical to the reference divide.
    """
    orig_shape, orig_dtype = x.shape, x.dtype
    x2d, total, padded = _to_lane2d(x)
    rows = x2d.shape[0]
    kernel = functools.partial(_quantize_kernel, bits=int(bits),
                               inv_delta=float(1.0 / delta))

    if rows <= _TILE_ROWS:
        out2d = pl.pallas_call(
            kernel,
            out_shape=jax.ShapeDtypeStruct((rows, _LANES), orig_dtype),
            in_specs=[pl.BlockSpec(memory_space=_VMEM)],
            out_specs=pl.BlockSpec(memory_space=_VMEM),
        )(x2d)
    else:
        nblk = pl.cdiv(rows, _TILE_ROWS)
        tile = pl.BlockSpec((_TILE_ROWS, _LANES), lambda i: (i, 0))
        # Ragged last block: out-of-bounds output writes are discarded, so no
        # row padding / post-slice copy is needed.
        out2d = pl.pallas_call(
            kernel,
            out_shape=jax.ShapeDtypeStruct((rows, _LANES), orig_dtype),
            grid=(nblk,),
            in_specs=[tile],
            out_specs=tile,
            compiler_params=pltpu.CompilerParams(
                dimension_semantics=("parallel",),
                vmem_limit_bytes=_ELEMWISE_VMEM_LIMIT),
        )(x2d)

    if padded:
        return out2d.reshape(-1)[:total].reshape(orig_shape)
    return out2d.reshape(orig_shape)


# ---------------------------------------------------------------------------
# kernel 3: (optionally quantized) linear forward  y = x @ w_t + b
# ---------------------------------------------------------------------------
def _linear_small_kernel(x_ref, wt_ref, b_ref, o_ref, *, quantize, bits,
                         inv_delta_b, out_scale, mxu_dtype):
    x = x_ref[...].astype(jnp.float32)
    if quantize:
        x = _quantize_value(x, bits, inv_delta_b)
    acc = jnp.dot(x.astype(mxu_dtype), wt_ref[...].astype(mxu_dtype),
                  preferred_element_type=jnp.float32)
    acc = acc + b_ref[...].astype(jnp.float32)
    if quantize:
        acc = acc * out_scale
    o_ref[...] = acc.astype(o_ref.dtype)


def _linear_tiled_kernel(x_ref, wt_ref, b_ref, o_ref, acc_ref, *, quantize,
                         bits, inv_delta_b, out_scale, mxu_dtype):
    @pl.when(pl.program_id(2) == 0)
    def _():
        acc_ref[...] = jnp.zeros_like(acc_ref)

    x = x_ref[...].astype(jnp.float32)
    if quantize:
        x = _quantize_value(x, bits, inv_delta_b)
    acc_ref[...] += jnp.dot(x.astype(mxu_dtype), wt_ref[...].astype(mxu_dtype),
                            preferred_element_type=jnp.float32)

    @pl.when(pl.program_id(2) == pl.num_programs(2) - 1)
    def _():
        out = acc_ref[...] + b_ref[...].astype(jnp.float32)  # bias at finalize
        if quantize:
            out = out * out_scale
        o_ref[...] = out.astype(o_ref.dtype)


def _linear_pallas(x, w_t, bias, *, quantize=False, bits=8, inv_delta_b=1.0,
                   out_scale=1.0, mxu_dtype=jnp.float32, out_dtype=None):
    """y = x @ w_t + bias, optionally quantizing x in-register and rescaling.

    w_t is the pre-transposed (K, N) weight — the canonical MXU RHS layout.
    """
    out_dtype = out_dtype if out_dtype is not None else x.dtype
    lead = x.shape[:-1]
    K = x.shape[-1]
    M = 1
    for d in lead:
        M *= int(d)
    Kw, N = w_t.shape
    assert Kw == K, (Kw, K)
    x2 = x.reshape(M, K)
    b2 = jnp.asarray(bias, jnp.float32).reshape(1, N)
    kern_kwargs = dict(quantize=bool(quantize), bits=int(bits),
                       inv_delta_b=float(inv_delta_b),
                       out_scale=float(out_scale), mxu_dtype=mxu_dtype)

    approx_bytes = 4 * (M * K + K * N + M * N + N)
    if approx_bytes <= _LINEAR_SMALL_BYTES:
        out = pl.pallas_call(
            functools.partial(_linear_small_kernel, **kern_kwargs),
            out_shape=jax.ShapeDtypeStruct((M, N), out_dtype),
            in_specs=[pl.BlockSpec(memory_space=_VMEM)] * 3,
            out_specs=pl.BlockSpec(memory_space=_VMEM),
        )(x2, w_t, b2)
        return out.reshape(*lead, N)

    # Tiled (M, N, K) grid: K innermost / "arbitrary" with a resident f32
    # accumulator, M / N "parallel" (megacore-sharded on v7x).
    tm, Mp = _pick_tile(M, 256, 8)
    tn, Np = _pick_tile(N, 256, 128)
    tk, Kp = _pick_tile(K, 512, 128)
    # Zero-pad to tile multiples (zeros are exactly neutral for the matmul,
    # the bias add and the quantizer); skipped entirely when dims divide.
    if (Mp, Kp) != (M, K):
        x2 = jnp.pad(x2, ((0, Mp - M), (0, Kp - K)))
    w_tp = w_t
    if (Kp, Np) != (K, N):
        # TODO(synk): for the cached quantized weight this pad could happen
        # once at cache time; the shapes used here divide so it never fires.
        w_tp = jnp.pad(w_t, ((0, Kp - K), (0, Np - N)))
    if Np != N:
        b2 = jnp.pad(b2, ((0, 0), (0, Np - N)))

    out = pl.pallas_call(
        functools.partial(_linear_tiled_kernel, **kern_kwargs),
        out_shape=jax.ShapeDtypeStruct((Mp, Np), out_dtype),
        grid=(Mp // tm, Np // tn, Kp // tk),
        in_specs=[pl.BlockSpec((tm, tk), lambda i, j, k: (i, k)),
                  pl.BlockSpec((tk, tn), lambda i, j, k: (k, j)),
                  pl.BlockSpec((1, tn), lambda i, j, k: (0, j))],
        out_specs=pl.BlockSpec((tm, tn), lambda i, j, k: (i, j)),
        scratch_shapes=[pltpu.VMEM((tm, tn), jnp.float32)],
        compiler_params=pltpu.CompilerParams(
            dimension_semantics=("parallel", "parallel", "arbitrary")),
    )(x2, w_tp, b2)
    if (Mp, Np) != (M, N):
        out = out[:M, :N]
    return out.reshape(*lead, N)


# ---------------------------------------------------------------------------
# modules
# ---------------------------------------------------------------------------
class PallasLinear:
    """Minimal nn.Linear stand-in (y = x @ W.T + b) backed by Pallas matmuls."""

    def __init__(self, weight, bias):
        self.weight = weight                   # (out_features, in_features)
        self.bias = bias                       # (out_features,)
        self._w_t = jnp.asarray(weight).T      # (in, out): built once

    def __call__(self, x):
        return _linear_pallas(x, self._w_t, self.bias, quantize=False,
                              mxu_dtype=jnp.float32, out_dtype=x.dtype)


class LinearQuant2:
    """JAX/Pallas port of LinearQuant2 (forward pass only)."""

    def __init__(self, name, param_bits, fwd_bits, module, delta_b=None,
                 overflow_rate=0.0, counter=10):
        self.delta_b = delta_b
        self.delta_list = []
        self.name = name
        self._counter = counter
        self.param_bits = param_bits
        self.fwd_bits = fwd_bits
        self.overflow_rate = overflow_rate
        self.module = module          # calibration-time (fp) module
        # q_module analogue: built once on the first quantized forward and
        # reused afterwards (weights are frozen by then, so semantics match).
        self.delta_a = None
        self.q_weight = None
        self.q_bias = None
        self._q_cache = None

    @property
    def counter(self):
        return self._counter

    def forward(self, input):
        if self._counter > 0:
            self._counter -= 1
            delta_b = compute_delta(input, self.fwd_bits, self.overflow_rate)
            self.delta_list.append(delta_b)
            output = self.module(input)
            if self._counter == 0:
                self.delta_list.sort()
                half = len(self.delta_list) // 2
                self.delta_b = self.delta_list[half]
            return output

        if self.delta_b is None:
            raise ValueError(
                "LinearQuant2(%r): quantized forward needs delta_b "
                "(run calibration or pass delta_b=...)" % self.name)

        if self._q_cache is None:
            # One-time: delta_a, quantized weight (pre-transposed to (K, N),
            # stored in the MXU feed dtype) and quantized bias.
            delta_a = compute_delta(self.module.weight, self.param_bits,
                                    self.overflow_rate)
            qw = linear_quantize2_pallas(self.module.weight, self.param_bits,
                                         delta_a)
            # Quantized values are exact in bf16 iff |q| <= 256 (bits <= 9);
            # bf16 MXU feed is ~3-4x faster than f32 and halves weight DMA.
            # TODO(synk): an int8 MXU path for v5e/v6e (never v7x) would be
            # faster still when matmul-bound; not implemented here.
            use_bf16 = self.param_bits <= 9 and self.fwd_bits <= 9
            mxu_dtype = jnp.bfloat16 if use_bf16 else jnp.float32
            q_bias = jnp.round(self.module.bias.astype(jnp.float32)
                               / (delta_a * self.delta_b))
            self.delta_a = delta_a
            self.q_weight = qw
            self.q_bias = q_bias.astype(self.module.bias.dtype)
            self._q_cache = (jnp.asarray(qw.T, dtype=mxu_dtype), q_bias,
                             mxu_dtype)

        w_t_q, q_bias, mxu_dtype = self._q_cache
        # Fused: activation quantization + matmul + bias + rescale.
        return _linear_pallas(
            input, w_t_q, q_bias,
            quantize=True, bits=self.fwd_bits,
            inv_delta_b=1.0 / self.delta_b,
            out_scale=self.delta_a * self.delta_b,
            mxu_dtype=mxu_dtype, out_dtype=input.dtype)

    __call__ = forward

    def __repr__(self):
        return ("{}(param_bits={}, fwd_bits={}, overflow_rate={}, counter={})"
                .format(self.__class__.__name__, self.param_bits,
                        self.fwd_bits, self.overflow_rate, self._counter))


# ---------------------------------------------------------------------------
# pure-JAX reference (mirrors the PyTorch code)
# ---------------------------------------------------------------------------
def _compute_delta_ref(t, bits, overflow_rate=0.0):
    abs_sorted = jnp.sort(jnp.abs(t).reshape(-1))[::-1]
    split_idx = int(overflow_rate * abs_sorted.shape[0])
    v = float(abs_sorted[split_idx])
    si = math.ceil(math.log(v + 1e-12, 2))
    sf = bits - 1 - si
    return math.pow(2.0, -sf)


def _linear_quantize2_ref(t, bits, delta):
    bound = math.pow(2.0, bits - 1)
    return jnp.clip(jnp.floor(t / delta + 0.5), -bound, bound - 1.0)


def _ref_forward_sequence(inputs, weight, bias, param_bits, fwd_bits, counter):
    outs, delta_list, delta_b, cnt = [], [], None, counter
    for x in inputs:
        if cnt > 0:
            cnt -= 1
            delta_list.append(_compute_delta_ref(x, fwd_bits))
            outs.append(x @ weight.T + bias)
            if cnt == 0:
                delta_list.sort()
                delta_b = delta_list[len(delta_list) // 2]
        else:
            delta_a = _compute_delta_ref(weight, param_bits)
            qw = _linear_quantize2_ref(weight, param_bits, delta_a)
            qb = jnp.round(bias / (delta_a * delta_b))
            qx = _linear_quantize2_ref(x, fwd_bits, delta_b)
            outs.append((qx @ qw.T + qb) * delta_a * delta_b)
    return outs, delta_b


if __name__ == "__main__":
    key = jax.random.PRNGKey(0)
    k_w, k_b, k_x, k_w2, k_b2, k_x2 = jax.random.split(key, 6)

    # ---- small module: Linear(32 -> 32), input (2, 8, 32), 3 calib + 1 quant
    B, S, H, O = 2, 8, 32, 32
    weight = jax.random.normal(k_w, (O, H), jnp.float32) * 0.1
    bias = jax.random.normal(k_b, (O,), jnp.float32) * 0.1
    module = LinearQuant2("fc_quant", param_bits=8, fwd_bits=8,
                          module=PallasLinear(weight, bias),
                          overflow_rate=0.0, counter=3)
    xs = [jax.random.normal(jax.random.fold_in(k_x, i), (B, S, H), jnp.float32)
          for i in range(4)]
    outs = [jax.block_until_ready(module(x)) for x in xs]

    ref_outs, ref_delta_b = _ref_forward_sequence(
        xs, weight, bias, param_bits=8, fwd_bits=8, counter=3)
    assert module.delta_b == ref_delta_b, (module.delta_b, ref_delta_b)
    for o in outs:
        assert o.shape == (B, S, O) and o.dtype == jnp.float32
    for i in range(3):   # fp calibration matmuls (MXU vs XLA rounding)
        assert jnp.allclose(outs[i], ref_outs[i], atol=5e-2, rtol=5e-2), i
    # Quantized pass: integer arithmetic + power-of-two scales.
    assert jnp.allclose(outs[3], ref_outs[3], atol=1e-4, rtol=1e-4)

    # ---- exercise the tiled elementwise paths (ragged last block) ----------
    big = jax.random.normal(jax.random.fold_in(key, 99), (1200, 1024),
                            jnp.float32)
    v_big = float(jax.block_until_ready(max_abs_pallas(big)))
    assert abs(v_big - float(jnp.max(jnp.abs(big)))) < 1e-6
    q_big = jax.block_until_ready(linear_quantize2_pallas(big, 8, 0.03125))
    assert jnp.allclose(q_big, _linear_quantize2_ref(big, 8, 0.03125))

    # ---- exercise the tiled (M, N, K)-grid linear (calib + quantized) ------
    H2, O2, B2, S2 = 1024, 512, 4, 128
    w2 = jax.random.normal(k_w2, (O2, H2), jnp.float32) * 0.1
    b2 = jax.random.normal(k_b2, (O2,), jnp.float32) * 0.1
    mod2 = LinearQuant2("fc_big", param_bits=8, fwd_bits=8,
                        module=PallasLinear(w2, b2), counter=1)
    xb = [jax.random.normal(jax.random.fold_in(k_x2, i), (B2, S2, H2),
                            jnp.float32) for i in range(2)]
    outs2 = [jax.block_until_ready(mod2(x)) for x in xb]
    ref2, _ = _ref_forward_sequence(xb, w2, b2, 8, 8, counter=1)
    assert outs2[1].shape == (B2, S2, O2)
    assert jnp.allclose(outs2[0], ref2[0], atol=5e-2, rtol=5e-2)
    assert jnp.allclose(outs2[1], ref2[1], atol=1e-3, rtol=1e-3)

    print("KERNEL_OK")
</pallas_src>

<mosaic_0001>
module attributes {stable_mosaic.version = 11 : i64} {
  func.func @_maxabs_small_kernel(%arg0: memref<4x128xf32, #tpu.memory_space<vmem>>, %arg1: memref<1x1xf32, #tpu.memory_space<smem>>) attributes {dimension_semantics = [], scalar_prefetch = 0 : i64, scratch_operands = 0 : i64, tpu.core_type = #tpu.core_type<tc>} {
    %c0 = arith.constant 0 : index
    %c0_0 = arith.constant 0 : index
    %0 = vector.load %arg0[%c0, %c0_0] : memref<4x128xf32, #tpu.memory_space<vmem>>, vector<4x128xf32>
    %1 = math.absf %0 : vector<4x128xf32>
    %2 = vector.shape_cast %1 : vector<4x128xf32> to vector<1x4x128xf32>
    %cst = arith.constant dense<0xFF800000> : vector<1xf32>
    %3 = vector.multi_reduction <maximumf>, %2, %cst [1, 2] : vector<1x4x128xf32> to vector<1xf32>
    %4 = vector.shape_cast %3 : vector<1xf32> to vector<1x1x1xf32>
    %5 = vector.extract %4[0, 0, 0] : f32 from vector<1x1x1xf32>
    %c0_1 = arith.constant 0 : index
    %c0_2 = arith.constant 0 : index
    %6 = memref.load %arg1[%c0_1, %c0_2] : memref<1x1xf32, #tpu.memory_space<smem>>
    memref.store %5, %arg1[%c0_1, %c0_2] : memref<1x1xf32, #tpu.memory_space<smem>>
    return
  }
}

</mosaic_0001>

<bundles_post_ra>
// kernel: tpu_custom_call.1
= control target key start
LH: loop header
LB: loop body
LE: loop exit
PB: predicated region body
PF: predicated region fallthrough
CT: control target
= control target key end

     0   :  { %6 = vsyncpa [#allocation3], 0  ;;  %s126_s0 = inlined_call_operand.hbm [shape: f32[4,128], index: 0, kind: input, shape index: {}]   ;;  %s127_s1 = inlined_call_operand.hbm [shape: f32[1,1], index: 1, kind: output, shape index: {}]  }
   0x1   :  { %7 = vsyncpa [#allocation4], 0  ;;  %s90_s6 = smov [#allocation2]   ;;  %s54_s10 = scalar_lea.hbm %s126_s0, 64 }
   0x2   :  { %s14_s7 = sshll.u32 %s90_s6, 4  ;;  %p55_p0 = scmp.ne.s32.totalorder %s126_s0, %s54_s10  ;;  %s15_s7 = int_to_ptr.vmem [resolvable:$true] %s14_s7 }
   0x3   :  { %p58_p1 = scmp.lt.u32.totalorder %s54_s10, %s126_s0 }
   0x5   :  { %p60_p2 = pnand %p58_p1, %p55_p0 }
   0x7   :  { %63 = shalt.err (!%p60_p2)
}
   0x8   :  { %s64_s15 = scalar_lea.vmem %s15_s7, 64  ;;  %p69_p4 = scmp.lt.s32.totalorder %s15_s7, %s15_s7 }
   0x9   :  { %p65_p3 = scmp.ne.s32.totalorder %s15_s7, %s64_s15  ;;  %p70_p5 = scmp.lt.s32.totalorder %s64_s15, %s64_s15 }
   0xb   :  { %p71_p6 = por %p70_p5, %p69_p4 }
   0xd   :  { %p72_p7 = pnand %p71_p6, %p65_p3 }
   0xf   :  { %75 = shalt.err (!%p72_p7)
}
  0x10   :  { %17 = dma.hbm_to_vmem [thread:$0]  %s126_s0, 64, %s15_s7, [#allocation3]  }
  0x11   :  { %86 = dma.done.wait [#allocation3], 64  }
  0x12   :  { %87 = vsyncadd [#allocation3], 4294967232  ;;  %v21_v0 = vld [vmem:[#allocation2] sm:$0xf]  ;;  %vm23_vm0 = vcmask 1043456   ;;  %s76_s0 = scalar_lea.hbm %s127_s1, 16 }
  0x13   :  { %v22_v1 = vand.u32 2147483647, %v21_v0  ;;  %p77_p8 = scmp.ne.s32.totalorder %s127_s1, %s76_s0  ;;  %p80_p9 = scmp.lt.u32.totalorder %s76_s0, %s127_s1 }
  0x15   :  { %v24_v2 = vsel %vm23_vm0, %v22_v1, -inf  ;;  %p82_p10 = pnand %p80_p9, %p77_p8 }
  0x16   :  { %25 = vmax.xlane.f32.xlu0 %v24_v2 }
  0xa3   :  { %v26_v3 = vpop.xlane.xlu0 %25 }
  0xa4   :  { %v27_v4 = vrot.slane %v26_v3, 4 }
  0xa6   :  { %v28_v5 = vmax.f32 %v26_v3, %v27_v4 }
  0xa8   :  { %v29_v6 = vrot.slane %v28_v5, 2 }
  0xaa   :  { %v30_v7 = vmax.f32 %v28_v5, %v29_v6 }
  0xac   :  { %v31_v8 = vrot.slane %v30_v7, 1 }
  0xae   :  { %v32_v9 = vmax.f32 %v30_v7, %v31_v8 }
  0xb0   :  { %50 = vpush %v32_v9 }
  0xe1   :  { %s51_s18 = spop %50 }
  0xe2   :  { %35 = sst [smem:[#allocation5]] %s51_s18 }
  0xe3   :  { %85 = shalt.err (!%p82_p10)
}
  0xe4   :  { %s91_s25 = smov [#allocation5]  }
  0xe5   :  { %43 = dma.smem_to_hbm %s91_s25, 16, %s127_s1, [#allocation4]  }
  0xe6   :  { %88 = dma.done.wait [#allocation4], 16  }
  0xe7   :  { %89 = vsyncadd [#allocation4], 4294967280 }
  0xe8   :  { %47 = sfence }
  0xe9   :  { %48 = vsyncpa [#allocation3], 1 }
  0xea   :  { %49 = vsyncpa [#allocation4], 1 }

</bundles_post_ra>
